<compile_context>
chip_gen: v6e
topology: v6e:2x2x1
jax: 0.10.0
libtpu: 0.0.40
codegen_flags: <defaults>
</compile_context>

<pallas_src>
import functools
import math

import jax
import jax.numpy as jnp
from jax.experimental import pallas as pl
from jax.experimental.pallas import tpu as pltpu

_PREC = jax.lax.Precision.HIGHEST  # reference path only


# --------------------------- tiling heuristics -------------------------------

def _choose_batch_tile(B, T):
    """Batch tile BT (== padded B, or a multiple of 8) and padded batch size."""
    if B <= 8:
        return B, B
    bt = max(8, (256 + T - 1) // T)           # aim for >=256 GEMM rows per step
    bt = ((bt + 7) // 8) * 8
    bt = min(bt, 64, ((B + 7) // 8) * 8)
    b_pad = ((B + bt - 1) // bt) * bt
    return bt, b_pad


def _pad_batch(a, b_pad):
    if a.shape[0] == b_pad:
        return a
    pad = [(0, b_pad - a.shape[0])] + [(0, 0)] * (a.ndim - 1)
    return jnp.pad(a, pad)


# --------------------- kernel 1: hoisted i2h projection ----------------------

def _i2h_proj_kernel(x_ref, w_ref, o_ref):
    """[BT, T, I] @ [I, H] -> [BT, T, H] (bf16 inputs, f32 accumulate)."""
    bt, t, i = x_ref.shape
    h = o_ref.shape[-1]
    x2d = x_ref[...].reshape(bt * t, i)
    y = jnp.dot(x2d, w_ref[...], preferred_element_type=jnp.float32)
    o_ref[...] = y.reshape(bt, t, h)


def i2h_projection_pallas(params, batch_H):
    """Step-invariant projection; compute once per sequence in a decode loop."""
    B, T, I = batch_H.shape
    H = params['w_i2h'].shape[1]
    BT, Bp = _choose_batch_tile(B, T)
    x = _pad_batch(batch_H.astype(jnp.bfloat16), Bp)

    out = pl.pallas_call(
        _i2h_proj_kernel,
        grid=(Bp // BT,),
        out_shape=jax.ShapeDtypeStruct((Bp, T, H), jnp.float32),
        in_specs=[
            pl.BlockSpec((BT, T, I), lambda b: (b, 0, 0)),
            pl.BlockSpec((I, H), lambda b: (0, 0)),
        ],
        out_specs=pl.BlockSpec((BT, T, H), lambda b: (b, 0, 0)),
        compiler_params=pltpu.CompilerParams(
            dimension_semantics=("parallel",),
            vmem_limit_bytes=64 * 1024 * 1024),
    )(x, params['w_i2h'].astype(jnp.bfloat16))
    return out[:B]


# ------------------------ kernel 2: fused attention cell ---------------------

def _attention_cell_kernel(hidden_size,
                           proj_ref, x_ref, h0_ref, c0_ref,
                           w_h2h_ref, b_h2h_ref, w_score_ref,
                           w_gate_ref, gbias_ref,
                           hc_out_ref, alpha_out_ref):
    """One batch tile per grid step; all intermediates stay in VMEM/vregs."""
    H = hidden_size
    f32, bf16 = jnp.float32, jnp.bfloat16

    h0_bf = h0_ref[...]                                             # [BT, H] bf16

    # ---- attention scores: e = score(tanh(proj_H + h2h(h0))), lane-dense in T
    proj_h = jnp.dot(h0_bf, w_h2h_ref[...],
                     preferred_element_type=f32) + b_h2h_ref[...]   # [BT, H]
    t = jnp.tanh(proj_ref[...] + proj_h[:, None, :])                # [BT, T, H]
    e = jnp.sum(t * w_score_ref[...][None, :, :], axis=-1)          # [BT, T]

    # ---- softmax over T (lane reductions; divide on the EUP) ----
    m = jnp.max(e, axis=-1, keepdims=True)
    p = jnp.exp(e - m)
    denom = jnp.sum(p, axis=-1, keepdims=True)
    alpha = p * pl.reciprocal(denom, approx=True)                   # [BT, T]
    alpha_out_ref[...] = alpha

    # ---- context = alpha @ batch_H : batched [1,T]@[T,I] on the MXU ----
    ctx = jnp.einsum('bqt,bti->bqi',
                     alpha[:, None, :].astype(bf16), x_ref[...],
                     preferred_element_type=f32)[:, 0, :]           # [BT, I]

    # ---- single fused LSTM gate GEMM: [ctx | h0] @ [W_ih_ctx ; W_hh] + bias
    lhs = jnp.concatenate([ctx.astype(bf16), h0_bf], axis=-1)       # [BT, I+H]
    gates = (jnp.dot(lhs, w_gate_ref[...], preferred_element_type=f32)
             + gbias_ref[...])                                      # [BT, 4H]

    def sigmoid(z):
        return pl.reciprocal(1.0 + jnp.exp(-z), approx=True)

    i_g = sigmoid(gates[:, 0:H])
    f_g = sigmoid(gates[:, H:2 * H])
    g_g = jnp.tanh(gates[:, 2 * H:3 * H])
    o_g = sigmoid(gates[:, 3 * H:4 * H])

    c_new = f_g * c0_ref[...] + i_g * g_g
    h_new = o_g * jnp.tanh(c_new)
    # pack h|c into one lane-dense store
    hc_out_ref[...] = jnp.concatenate([h_new, c_new], axis=-1)      # [BT, 2H]


# ------------------------------ JAX wrapper ----------------------------------

def attention_cell_pallas(params, prev_hidden, batch_H, char_onehots,
                          batch_H_proj=None):
    """Returns ((h_new [B,H], c_new [B,H]), alpha [B,T,1]).

    In a decode loop, precompute `batch_H_proj = i2h_projection_pallas(...)`
    once per sequence and pass it in; otherwise it is computed here.
    """
    h0, c0 = prev_hidden
    B, T, I = batch_H.shape
    H = params['w_h2h'].shape[0]
    f32, bf16 = jnp.float32, jnp.bfloat16

    if batch_H_proj is None:
        batch_H_proj = i2h_projection_pallas(params, batch_H)

    # one-hot @ W_emb is a row gather; fold it + the LSTM bias into a
    # per-element gate bias outside the kernel (exact; removes E from kernel).
    gate_bias = (jnp.dot(char_onehots.astype(f32), params['w_ih_emb'],
                         precision=_PREC) + params['b_lstm'])

    BT, Bp = _choose_batch_tile(B, T)

    args = [
        _pad_batch(batch_H_proj.astype(f32), Bp),   # [Bp, T, H]
        _pad_batch(batch_H.astype(bf16), Bp),       # [Bp, T, I]
        _pad_batch(h0.astype(bf16), Bp),            # [Bp, H]
        _pad_batch(c0.astype(f32), Bp),             # [Bp, H]
        params['w_h2h'].astype(bf16),               # [H, H]
        params['b_h2h'].astype(f32),                # [1, H]
        params['w_score'].astype(f32),               # [1, H]
        params['w_gate'].astype(bf16),              # [I+H, 4H]
        _pad_batch(gate_bias.astype(f32), Bp),      # [Bp, 4H]
    ]

    in_specs = [
        pl.BlockSpec((BT, T, H), lambda b: (b, 0, 0)),
        pl.BlockSpec((BT, T, I), lambda b: (b, 0, 0)),
        pl.BlockSpec((BT, H), lambda b: (b, 0)),
        pl.BlockSpec((BT, H), lambda b: (b, 0)),
        pl.BlockSpec((H, H), lambda b: (0, 0)),
        pl.BlockSpec((1, H), lambda b: (0, 0)),
        pl.BlockSpec((1, H), lambda b: (0, 0)),
        pl.BlockSpec((I + H, 4 * H), lambda b: (0, 0)),
        pl.BlockSpec((BT, 4 * H), lambda b: (b, 0)),
    ]
    out_shape = (
        jax.ShapeDtypeStruct((Bp, 2 * H), f32),     # packed [h | c]
        jax.ShapeDtypeStruct((Bp, T), f32),         # lane-dense alpha
    )
    out_specs = (
        pl.BlockSpec((BT, 2 * H), lambda b: (b, 0)),
        pl.BlockSpec((BT, T), lambda b: (b, 0)),
    )

    kernel = functools.partial(_attention_cell_kernel, H)
    hc, alpha = pl.pallas_call(
        kernel,
        grid=(Bp // BT,),
        out_shape=out_shape,
        in_specs=in_specs,
        out_specs=out_specs,
        compiler_params=pltpu.CompilerParams(
            dimension_semantics=("parallel",),      # shard batch tiles over TCs
            vmem_limit_bytes=64 * 1024 * 1024),
    )(*args)

    h_new = hc[:B, :H]
    c_new = hc[:B, H:]
    return (h_new, c_new), alpha[:B][:, :, None]


# --------------------------- plain-JAX reference -----------------------------

def attention_cell_ref(params, prev_hidden, batch_H, char_onehots):
    h0, c0 = prev_hidden
    H = params['w_h2h'].shape[0]
    I = params['w_i2h'].shape[0]
    proj_H = jnp.einsum('bti,ih->bth', batch_H, params['w_i2h'],
                        precision=_PREC)
    proj_h = jnp.dot(h0, params['w_h2h'], precision=_PREC) + params['b_h2h']
    e = jnp.sum(jnp.tanh(proj_H + proj_h[:, None, :])
                * params['w_score'][0][None, None, :], axis=-1, keepdims=True)
    alpha = jax.nn.softmax(e, axis=1)                       # [B, T, 1]
    context = jnp.sum(alpha * batch_H, axis=1)              # [B, I]
    gates = (jnp.dot(context, params['w_gate'][:I], precision=_PREC)
             + jnp.dot(h0, params['w_gate'][I:], precision=_PREC)
             + jnp.dot(char_onehots, params['w_ih_emb'], precision=_PREC)
             + params['b_lstm'])
    i_g = jax.nn.sigmoid(gates[:, 0:H])
    f_g = jax.nn.sigmoid(gates[:, H:2 * H])
    g_g = jnp.tanh(gates[:, 2 * H:3 * H])
    o_g = jax.nn.sigmoid(gates[:, 3 * H:4 * H])
    c_new = f_g * c0 + i_g * g_g
    h_new = o_g * jnp.tanh(c_new)
    return (h_new, c_new), alpha


# ------------------------------- parameters ----------------------------------

def init_attention_cell_params(key, input_size, hidden_size, num_embeddings):
    """PyTorch-style uniform init, stored pre-transposed as [in, out]."""
    ks = jax.random.split(key, 8)

    def u(k, shape, fan_in):
        bound = 1.0 / math.sqrt(fan_in)
        return jax.random.uniform(k, shape, jnp.float32, -bound, bound)

    in_cat = input_size + num_embeddings
    w_ih = u(ks[4], (in_cat, 4 * hidden_size), in_cat)       # LSTM weight_ih.T
    w_hh = u(ks[5], (hidden_size, 4 * hidden_size), hidden_size)
    params = {
        'w_i2h': u(ks[0], (input_size, hidden_size), input_size),
        'w_h2h': u(ks[1], (hidden_size, hidden_size), hidden_size),
        'b_h2h': u(ks[2], (1, hidden_size), hidden_size),
        'w_score': u(ks[3], (1, hidden_size), hidden_size),
        # [context | h0] gate weight, pre-concatenated -> single gate GEMM
        'w_gate': jnp.concatenate([w_ih[:input_size], w_hh], axis=0),
        'w_ih_emb': w_ih[input_size:],                        # [E, 4H]
        # bias_ih + bias_hh pre-folded
        'b_lstm': (u(ks[6], (1, 4 * hidden_size), in_cat)
                   + u(ks[7], (1, 4 * hidden_size), hidden_size)),
    }
    return params


# ----------------------------------- main -------------------------------------

if __name__ == "__main__":
    key = jax.random.PRNGKey(0)
    B, T, I, H, E = 2, 8, 32, 32, 16      # batch, seq, input, hidden, embeds

    ks = jax.random.split(key, 6)
    batch_H = jax.random.normal(ks[0], (B, T, I), jnp.float32)
    h0 = 0.5 * jax.random.normal(ks[1], (B, H), jnp.float32)
    c0 = 0.5 * jax.random.normal(ks[2], (B, H), jnp.float32)
    char_ids = jax.random.randint(ks[3], (B,), 0, E)
    char_onehots = jax.nn.one_hot(char_ids, E, dtype=jnp.float32)
    params = init_attention_cell_params(ks[4], I, H, E)

    fwd_pallas = jax.jit(
        lambda hc, bh, oh: attention_cell_pallas(params, hc, bh, oh))
    (h_new, c_new), alpha = jax.block_until_ready(
        fwd_pallas((h0, c0), batch_H, char_onehots))

    fwd_ref = jax.jit(
        lambda hc, bh, oh: attention_cell_ref(params, hc, bh, oh))
    (h_ref, c_ref), a_ref = jax.block_until_ready(
        fwd_ref((h0, c0), batch_H, char_onehots))

    assert h_new.shape == (B, H) and c_new.shape == (B, H), (h_new.shape,
                                                             c_new.shape)
    assert alpha.shape == (B, T, 1), alpha.shape

    def check(name, got, ref, tol=3e-2):   # bf16 MXU inputs + approx recip
        err = float(jnp.max(jnp.abs(got.astype(jnp.float32) - ref)))
        mag = max(1.0, float(jnp.max(jnp.abs(ref))))
        assert err <= tol * mag, f"{name} mismatch: {err} (ref mag {mag})"

    check("h", h_new, h_ref)
    check("c", c_new, c_ref)
    check("alpha", alpha, a_ref)

    print("KERNEL_OK")
</pallas_src>

<mosaic_0001>
module attributes {stable_mosaic.version = 11 : i64} {
  func.func @_i2h_proj_kernel(%arg0: i32, %arg1: memref<2x8x32xbf16, #tpu.memory_space<vmem>>, %arg2: memref<32x32xbf16, #tpu.memory_space<vmem>>, %arg3: memref<2x8x32xf32, #tpu.memory_space<vmem>>) attributes {dimension_semantics = [#tpu.dimension_semantics<parallel>], iteration_bounds = array<i64: 1>, scalar_prefetch = 0 : i64, scratch_operands = 0 : i64, tpu.core_type = #tpu.core_type<tc>, window_params = [{transform_indices = @transform_0, window_bounds = array<i64: 2, 8, 32>}, {pipeline_mode = #tpu.pipeline_mode<synchronous>, transform_indices = @transform_1, window_bounds = array<i64: 32, 32>}, {transform_indices = @transform_2, window_bounds = array<i64: 2, 8, 32>}]} {
    %c0 = arith.constant 0 : index
    %c0_0 = arith.constant 0 : index
    %c0_1 = arith.constant 0 : index
    %0 = vector.load %arg1[%c0, %c0_0, %c0_1] : memref<2x8x32xbf16, #tpu.memory_space<vmem>>, vector<2x8x32xbf16>
    %1 = vector.shape_cast %0 : vector<2x8x32xbf16> to vector<16x32xbf16>
    %c0_2 = arith.constant 0 : index
    %c0_3 = arith.constant 0 : index
    %2 = vector.load %arg2[%c0_2, %c0_3] : memref<32x32xbf16, #tpu.memory_space<vmem>>, vector<32x32xbf16>
    %cst = arith.constant dense<0.000000e+00> : vector<16x32xf32>
    %3 = tpu.matmul %1, %2, %cst {dimension_numbers = #tpu.dot_dimension_numbers<[1], [0], [0], [1], [0, 0, 1, 1], [], []>} : vector<16x32xbf16>, vector<32x32xbf16>, vector<16x32xf32> -> vector<16x32xf32>
    %4 = vector.shape_cast %3 : vector<16x32xf32> to vector<2x8x32xf32>
    %c0_4 = arith.constant 0 : index
    %c0_5 = arith.constant 0 : index
    %c0_6 = arith.constant 0 : index
    %5 = vector.load %arg3[%c0_4, %c0_5, %c0_6] : memref<2x8x32xf32, #tpu.memory_space<vmem>>, vector<2x8x32xf32>
    tpu.vector_store %arg3[%c0_4, %c0_5, %c0_6], %4 {strides = array<i32>} : memref<2x8x32xf32, #tpu.memory_space<vmem>>, vector<2x8x32xf32>,
    return
  }
  func.func @transform_0(%arg0: i32) -> (i32, i32, i32) {
    %c0_i32 = arith.constant 0 : i32
    %c0_i32_0 = arith.constant 0 : i32
    %c0_i32_1 = arith.constant 0 : i32
    return %arg0, %c0_i32, %c0_i32_0 : i32, i32, i32
  }
  func.func @transform_1(%arg0: i32) -> (i32, i32) {
    %c0_i32 = arith.constant 0 : i32
    %c0_i32_0 = arith.constant 0 : i32
    %c0_i32_1 = arith.constant 0 : i32
    return %c0_i32, %c0_i32_0 : i32, i32
  }
  func.func @transform_2(%arg0: i32) -> (i32, i32, i32) {
    %c0_i32 = arith.constant 0 : i32
    %c0_i32_0 = arith.constant 0 : i32
    %c0_i32_1 = arith.constant 0 : i32
    return %arg0, %c0_i32, %c0_i32_0 : i32, i32, i32
  }
}

module attributes {stable_mosaic.version = 11 : i64} {
  func.func @_attention_cell_kernel(%arg0: i32, %arg1: memref<2x8x32xf32, #tpu.memory_space<vmem>>, %arg2: memref<2x8x32xbf16, #tpu.memory_space<vmem>>, %arg3: memref<2x32xbf16, #tpu.memory_space<vmem>>, %arg4: memref<2x32xf32, #tpu.memory_space<vmem>>, %arg5: memref<32x32xbf16, #tpu.memory_space<vmem>>, %arg6: memref<1x32xf32, #tpu.memory_space<vmem>>, %arg7: memref<1x32xf32, #tpu.memory_space<vmem>>, %arg8: memref<64x128xbf16, #tpu.memory_space<vmem>>, %arg9: memref<2x128xf32, #tpu.memory_space<vmem>>, %arg10: memref<2x64xf32, #tpu.memory_space<vmem>>, %arg11: memref<2x8xf32, #tpu.memory_space<vmem>>) attributes {dimension_semantics = [#tpu.dimension_semantics<parallel>], iteration_bounds = array<i64: 1>, scalar_prefetch = 0 : i64, scratch_operands = 0 : i64, tpu.core_type = #tpu.core_type<tc>, window_params = [{transform_indices = @transform_0, window_bounds = array<i64: 2, 8, 32>}, {transform_indices = @transform_1, window_bounds = array<i64: 2, 8, 32>}, {transform_indices = @transform_2, window_bounds = array<i64: 2, 32>}, {transform_indices = @transform_3, window_bounds = array<i64: 2, 32>}, {pipeline_mode = #tpu.pipeline_mode<synchronous>, transform_indices = @transform_4, window_bounds = array<i64: 32, 32>}, {pipeline_mode = #tpu.pipeline_mode<synchronous>, transform_indices = @transform_5, window_bounds = array<i64: 1, 32>}, {pipeline_mode = #tpu.pipeline_mode<synchronous>, transform_indices = @transform_6, window_bounds = array<i64: 1, 32>}, {pipeline_mode = #tpu.pipeline_mode<synchronous>, transform_indices = @transform_7, window_bounds = array<i64: 64, 128>}, {transform_indices = @transform_8, window_bounds = array<i64: 2, 128>}, {transform_indices = @transform_9, window_bounds = array<i64: 2, 64>}, {transform_indices = @transform_10, window_bounds = array<i64: 2, 8>}]} {
    %c0 = arith.constant 0 : index
    %c0_0 = arith.constant 0 : index
    %0 = vector.load %arg3[%c0, %c0_0] : memref<2x32xbf16, #tpu.memory_space<vmem>>, vector<2x32xbf16>
    %c0_1 = arith.constant 0 : index
    %c0_2 = arith.constant 0 : index
    %1 = vector.load %arg5[%c0_1, %c0_2] : memref<32x32xbf16, #tpu.memory_space<vmem>>, vector<32x32xbf16>
    %cst = arith.constant dense<0.000000e+00> : vector<2x32xf32>
    %2 = tpu.matmul %0, %1, %cst {dimension_numbers = #tpu.dot_dimension_numbers<[1], [0], [0], [1], [0, 0, 1, 1], [], []>} : vector<2x32xbf16>, vector<32x32xbf16>, vector<2x32xf32> -> vector<2x32xf32>
    %c0_3 = arith.constant 0 : index
    %c0_4 = arith.constant 0 : index
    %3 = vector.load %arg6[%c0_3, %c0_4] : memref<1x32xf32, #tpu.memory_space<vmem>>, vector<1x32xf32>
    %4 = vector.broadcast %3 : vector<1x32xf32> to vector<2x32xf32>
    %5 = arith.addf %2, %4 : vector<2x32xf32>
    %c0_5 = arith.constant 0 : index
    %c0_6 = arith.constant 0 : index
    %c0_7 = arith.constant 0 : index
    %6 = vector.load %arg1[%c0_5, %c0_6, %c0_7] : memref<2x8x32xf32, #tpu.memory_space<vmem>>, vector<2x8x32xf32>
    %7 = vector.shape_cast %5 : vector<2x32xf32> to vector<2x1x32xf32>
    %8 = vector.broadcast %7 : vector<2x1x32xf32> to vector<2x8x32xf32>
    %9 = arith.addf %6, %8 : vector<2x8x32xf32>
    %10 = math.tanh %9 : vector<2x8x32xf32>
    %c0_8 = arith.constant 0 : index
    %c0_9 = arith.constant 0 : index
    %11 = vector.load %arg7[%c0_8, %c0_9] : memref<1x32xf32, #tpu.memory_space<vmem>>, vector<1x32xf32>
    %12 = vector.shape_cast %11 : vector<1x32xf32> to vector<1x1x32xf32>
    %13 = vector.broadcast %12 : vector<1x1x32xf32> to vector<2x8x32xf32>
    %14 = arith.mulf %10, %13 : vector<2x8x32xf32>
    %cst_10 = arith.constant dense<0.000000e+00> : vector<2x8xf32>
    %15 = vector.multi_reduction <add>, %14, %cst_10 [2] : vector<2x8x32xf32> to vector<2x8xf32>
    %cst_11 = arith.constant dense<0xFF800000> : vector<2xf32>
    %16 = vector.multi_reduction <maximumf>, %15, %cst_11 [1] : vector<2x8xf32> to vector<2xf32>
    %17 = vector.shape_cast %16 : vector<2xf32> to vector<2x1xf32>
    %18 = vector.broadcast %17 : vector<2x1xf32> to vector<2x8xf32>
    %19 = arith.subf %15, %18 : vector<2x8xf32>
    %20 = math.exp %19 : vector<2x8xf32>
    %cst_12 = arith.constant dense<0.000000e+00> : vector<2xf32>
    %21 = vector.multi_reduction <add>, %20, %cst_12 [1] : vector<2x8xf32> to vector<2xf32>
    %22 = vector.shape_cast %21 : vector<2xf32> to vector<2x1xf32>
    %23 = tpu.reciprocal %22 {approx = true} : vector<2x1xf32> -> vector<2x1xf32>
    %24 = vector.broadcast %23 : vector<2x1xf32> to vector<2x8xf32>
    %25 = arith.mulf %20, %24 : vector<2x8xf32>
    %c0_13 = arith.constant 0 : index
    %c0_14 = arith.constant 0 : index
    %26 = vector.load %arg11[%c0_13, %c0_14] : memref<2x8xf32, #tpu.memory_space<vmem>>, vector<2x8xf32>
    tpu.vector_store %arg11[%c0_13, %c0_14], %25 {strides = array<i32>} : memref<2x8xf32, #tpu.memory_space<vmem>>, vector<2x8xf32>,
    %27 = vector.shape_cast %25 : vector<2x8xf32> to vector<2x1x8xf32>
    %28 = arith.truncf %27 : vector<2x1x8xf32> to vector<2x1x8xbf16>
    %c0_15 = arith.constant 0 : index
    %c0_16 = arith.constant 0 : index
    %c0_17 = arith.constant 0 : index
    %29 = vector.load %arg2[%c0_15, %c0_16, %c0_17] : memref<2x8x32xbf16, #tpu.memory_space<vmem>>, vector<2x8x32xbf16>
    "tpu.trace_start"() <{level = 10 : i32, message = "bqt,bti->bqi"}> : () -> ()
    %cst_18 = arith.constant dense<0.000000e+00> : vector<2x1x32xf32>
    %30 = tpu.matmul %28, %29, %cst_18 {dimension_numbers = #tpu.dot_dimension_numbers<[2], [1], [1], [2], [0, 0, 0, 1, 1, 2], [0], [0]>} : vector<2x1x8xbf16>, vector<2x8x32xbf16>, vector<2x1x32xf32> -> vector<2x1x32xf32>
    "tpu.trace_stop"() : () -> ()
    %31 = vector.shape_cast %30 : vector<2x1x32xf32> to vector<2x32xf32>
    %32 = arith.truncf %31 : vector<2x32xf32> to vector<2x32xbf16>
    %33 = tpu.concatenate %32, %0 in 1 : vector<2x32xbf16>, vector<2x32xbf16> -> vector<2x64xbf16>
    %c0_19 = arith.constant 0 : index
    %c0_20 = arith.constant 0 : index
    %34 = vector.load %arg8[%c0_19, %c0_20] : memref<64x128xbf16, #tpu.memory_space<vmem>>, vector<64x128xbf16>
    %cst_21 = arith.constant dense<0.000000e+00> : vector<2x128xf32>
    %35 = tpu.matmul %33, %34, %cst_21 {dimension_numbers = #tpu.dot_dimension_numbers<[1], [0], [0], [1], [0, 0, 1, 1], [], []>} : vector<2x64xbf16>, vector<64x128xbf16>, vector<2x128xf32> -> vector<2x128xf32>
    %c0_22 = arith.constant 0 : index
    %c0_23 = arith.constant 0 : index
    %36 = vector.load %arg9[%c0_22, %c0_23] : memref<2x128xf32, #tpu.memory_space<vmem>>, vector<2x128xf32>
    %37 = arith.addf %35, %36 : vector<2x128xf32>
    %38 = vector.extract_strided_slice %37 {offsets = [0, 0], sizes = [2, 32], strides = [1, 1]} : vector<2x128xf32> to vector<2x32xf32>
    %cst_24 = arith.constant 0.000000e+00 : f32
    %39 = vector.broadcast %cst_24 : f32 to vector<2x32xf32>
    %40 = arith.subf %39, %38 : vector<2x32xf32>
    %41 = math.exp %40 : vector<2x32xf32>
    %cst_25 = arith.constant 1.000000e+00 : f32
    %42 = vector.broadcast %cst_25 : f32 to vector<2x32xf32>
    %43 = arith.addf %42, %41 : vector<2x32xf32>
    %44 = tpu.reciprocal %43 {approx = true} : vector<2x32xf32> -> vector<2x32xf32>
    %45 = vector.extract_strided_slice %37 {offsets = [0, 32], sizes = [2, 32], strides = [1, 1]} : vector<2x128xf32> to vector<2x32xf32>
    %cst_26 = arith.constant 0.000000e+00 : f32
    %46 = vector.broadcast %cst_26 : f32 to vector<2x32xf32>
    %47 = arith.subf %46, %45 : vector<2x32xf32>
    %48 = math.exp %47 : vector<2x32xf32>
    %cst_27 = arith.constant 1.000000e+00 : f32
    %49 = vector.broadcast %cst_27 : f32 to vector<2x32xf32>
    %50 = arith.addf %49, %48 : vector<2x32xf32>
    %51 = tpu.reciprocal %50 {approx = true} : vector<2x32xf32> -> vector<2x32xf32>
    %52 = vector.extract_strided_slice %37 {offsets = [0, 64], sizes = [2, 32], strides = [1, 1]} : vector<2x128xf32> to vector<2x32xf32>
    %53 = math.tanh %52 : vector<2x32xf32>
    %54 = vector.extract_strided_slice %37 {offsets = [0, 96], sizes = [2, 32], strides = [1, 1]} : vector<2x128xf32> to vector<2x32xf32>
    %cst_28 = arith.constant 0.000000e+00 : f32
    %55 = vector.broadcast %cst_28 : f32 to vector<2x32xf32>
    %56 = arith.subf %55, %54 : vector<2x32xf32>
    %57 = math.exp %56 : vector<2x32xf32>
    %cst_29 = arith.constant 1.000000e+00 : f32
    %58 = vector.broadcast %cst_29 : f32 to vector<2x32xf32>
    %59 = arith.addf %58, %57 : vector<2x32xf32>
    %60 = tpu.reciprocal %59 {approx = true} : vector<2x32xf32> -> vector<2x32xf32>
    %c0_30 = arith.constant 0 : index
    %c0_31 = arith.constant 0 : index
    %61 = vector.load %arg4[%c0_30, %c0_31] : memref<2x32xf32, #tpu.memory_space<vmem>>, vector<2x32xf32>
    %62 = arith.mulf %51, %61 : vector<2x32xf32>
    %63 = arith.mulf %44, %53 : vector<2x32xf32>
    %64 = arith.addf %62, %63 : vector<2x32xf32>
    %65 = math.tanh %64 : vector<2x32xf32>
    %66 = arith.mulf %60, %65 : vector<2x32xf32>
    %67 = tpu.concatenate %66, %64 in 1 : vector<2x32xf32>, vector<2x32xf32> -> vector<2x64xf32>
    %c0_32 = arith.constant 0 : index
    %c0_33 = arith.constant 0 : index
    %68 = vector.load %arg10[%c0_32, %c0_33] : memref<2x64xf32, #tpu.memory_space<vmem>>, vector<2x64xf32>
    tpu.vector_store %arg10[%c0_32, %c0_33], %67 {strides = array<i32>} : memref<2x64xf32, #tpu.memory_space<vmem>>, vector<2x64xf32>,
    return
  }
  func.func @transform_0(%arg0: i32) -> (i32, i32, i32) {
    %c0_i32 = arith.constant 0 : i32
    %c0_i32_0 = arith.constant 0 : i32
    %c0_i32_1 = arith.constant 0 : i32
    return %arg0, %c0_i32, %c0_i32_0 : i32, i32, i32
  }
  func.func @transform_1(%arg0: i32) -> (i32, i32, i32) {
    %c0_i32 = arith.constant 0 : i32
    %c0_i32_0 = arith.constant 0 : i32
    %c0_i32_1 = arith.constant 0 : i32
    return %arg0, %c0_i32, %c0_i32_0 : i32, i32, i32
  }
  func.func @transform_2(%arg0: i32) -> (i32, i32) {
    %c0_i32 = arith.constant 0 : i32
    %c0_i32_0 = arith.constant 0 : i32
    return %arg0, %c0_i32 : i32, i32
  }
  func.func @transform_3(%arg0: i32) -> (i32, i32) {
    %c0_i32 = arith.constant 0 : i32
    %c0_i32_0 = arith.constant 0 : i32
    return %arg0, %c0_i32 : i32, i32
  }
  func.func @transform_4(%arg0: i32) -> (i32, i32) {
    %c0_i32 = arith.constant 0 : i32
    %c0_i32_0 = arith.constant 0 : i32
    %c0_i32_1 = arith.constant 0 : i32
    return %c0_i32, %c0_i32_0 : i32, i32
  }
  func.func @transform_5(%arg0: i32) -> (i32, i32) {
    %c0_i32 = arith.constant 0 : i32
    %c0_i32_0 = arith.constant 0 : i32
    %c0_i32_1 = arith.constant 0 : i32
    return %c0_i32, %c0_i32_0 : i32, i32
  }
  func.func @transform_6(%arg0: i32) -> (i32, i32) {
    %c0_i32 = arith.constant 0 : i32
    %c0_i32_0 = arith.constant 0 : i32
    %c0_i32_1 = arith.constant 0 : i32
    return %c0_i32, %c0_i32_0 : i32, i32
  }
  func.func @transform_7(%arg0: i32) -> (i32, i32) {
    %c0_i32 = arith.constant 0 : i32
    %c0_i32_0 = arith.constant 0 : i32
    %c0_i32_1 = arith.constant 0 : i32
    return %c0_i32, %c0_i32_0 : i32, i32
  }
  func.func @transform_8(%arg0: i32) -> (i32, i32) {
    %c0_i32 = arith.constant 0 : i32
    %c0_i32_0 = arith.constant 0 : i32
    return %arg0, %c0_i32 : i32, i32
  }
  func.func @transform_9(%arg0: i32) -> (i32, i32) {
    %c0_i32 = arith.constant 0 : i32
    %c0_i32_0 = arith.constant 0 : i32
    return %arg0, %c0_i32 : i32, i32
  }
  func.func @transform_10(%arg0: i32) -> (i32, i32) {
    %c0_i32 = arith.constant 0 : i32
    %c0_i32_0 = arith.constant 0 : i32
    return %arg0, %c0_i32 : i32, i32
  }
}

</mosaic_0001>

<bundles_post_ra>
// kernel: _lambda_.2
= control target key start
LH: loop header
LB: loop body
LE: loop exit
PB: predicated region body
PF: predicated region fallthrough
CT: control target
= control target key end

     0   :  { %v106_v0 = vmov 0.0   ;;  %vm107_vm0 = vmmov 0   ;;  %vm35_vm1 = vcmask 261120   ;;  %s138_s1 = inlined_call_operand.vmem [shape: bf16[32,32], index: 1, kind: input, shape index: {}]   ;;  %s139_s0 = inlined_call_operand.vmem [shape: bf16[2,8,32], index: 0, kind: input, shape index: {}]   ;;  %s140_s2 = inlined_call_operand.vmem [shape: f32[2,8,32], index: 2, kind: output, shape index: {}]  }
   0x1   :  { %93 = vmatprep.subr.bf16.mxu0 %v106_v0  ;;  %v103_v1 = vld [vmem:[%s138_s1 + $0x8] sm:$0xff]   ;;  %97 = vmatprep.mubr.msk.bf16.mxu0 %vm107_vm0, %v106_v0  ;;  %v104_v2 = vld [vmem:[%s138_s1] sm:$0xff]  }
   0x2   :  { %94 = vmatpush3.bf16.msra.mxu0 %v103_v1  ;;  %v105_v3 = vld [vmem:[%s139_s0] sm:$0xff]  }
   0x3   :  { %95 = vmatprep.subr.bf16.mxu0 %v106_v0 }
   0x6   :  { %96 = vmatpush3.bf16.msra.mxu0 %v104_v2 }
   0x9   :  { %98 = vmatmul.mubr.msk.bf16.vlgmr.msra.gmra.mxu0 %vm35_vm1, %v105_v3 }
  0xc9   :  { %v73_v4 = vpop.f32.mrf.mxu0 }
  0xca   :  { %80 = vst.msk [vmem:[%s140_s2] sm:$0xff] %vm35_vm1, %v73_v4 }
  0xcb   :  { %v99_v5 = vpop.f32.mrf.mxu0 }
  0xcd   :  { %v76_v6 = vpop.f32.mrf.mxu0 }
  0xce   :  { %81 = vst.msk [vmem:[%s140_s2 + $0x8] sm:$0xff] %vm35_vm1, %v76_v6 }
  0xcf   :  { %v100_v7 = vpop.f32.mrf.mxu0 }

// kernel: _lambda_.3
= control target key start
LH: loop header
LB: loop body
LE: loop exit
PB: predicated region body
PF: predicated region fallthrough
CT: control target
= control target key end

     0   :  { %v635_v1 = vmov 0.0   ;;  %vm636_vm0 = vmmov 0   ;;  %vm60_vm1 = vcmask 261120   ;;  %s820_s0 = inlined_call_operand.vmem [shape: f32[2,8,32], index: 0, kind: input, shape index: {}]   ;;  %s821_s1 = inlined_call_operand.vmem [shape: bf16[2,8,32], index: 1, kind: input, shape index: {}]   ;;  %s822_s2 = inlined_call_operand.vmem [shape: bf16[2,32], index: 2, kind: input, shape index: {}]   ;;  %s823_s3 = inlined_call_operand.vmem [shape: f32[2,32], index: 3, kind: input, shape index: {}]   ;;  %s824_s4 = inlined_call_operand.vmem [shape: bf16[32,32], index: 4, kind: input, shape index: {}]   ;;  %s825_s5 = inlined_call_operand.vmem [shape: f32[1,32], index: 5, kind: input, shape index: {}]   ;;  %s826_s6 = inlined_call_operand.vmem [shape: f32[1,32], index: 6, kind: input, shape index: {}]   ;;  %s827_s7 = inlined_call_operand.vmem [shape: bf16[64,128], index: 7, kind: input, shape index: {}]   ;;  %s828_s8 = inlined_call_operand.vmem [shape: f32[2,128], index: 8, kind: input, shape index: {}]   ;;  %s829_s9 = inlined_call_operand.vmem [shape: f32[2,64], index: 9, kind: output, shape index: {0}]   ;;  %s830_s10 = inlined_call_operand.hbm [shape: f32[2,8], index: 10, kind: output, shape index: {1}]  }
   0x1   :  { %v589_v0 = vld [vmem:[%s824_s4 + $0x8] sm:$0xff]   ;;  %548 = vmatprep.subr.bf16.mxu0 %v635_v1  ;;  %556 = vmatprep.subr.bf16.mxu1 %v635_v1  ;;  %v590_v2 = vld [vmem:[%s824_s4] sm:$0xff]  }
   0x2   :  { %549 = vmatpush3.bf16.msra.mxu0 %v589_v0  ;;  %552 = vmatprep.mubr.msk.bf16.mxu0 %vm636_vm0, %v635_v1  ;;  %v713_v3 = vld [vmem:[%s822_s2] sm:$0x1] }
   0x3   :  { %550 = vmatprep.subr.bf16.mxu0 %v635_v1  ;;  %558 = vmatprep.mubr.msk.bf16.mxu1 %vm636_vm0, %v635_v1 }
   0x6   :  { %551 = vmatpush3.bf16.msra.mxu0 %v590_v2 }
   0x7   :  { %16 = vsyncpa [#allocation3], 0  ;;  %568 = vmatprep.subr.bf16.mxu0 %v635_v1  ;;  %v637_v4 = vmov 1966171168   ;;  %v110_v6 = vlaneseq  ;;  %v524_v9 = vld [vmem:[%s825_s5] ss:$0 sm:$0xff] }
   0x8   :  { %v108_v5 = vunpack.c.l.s4 %v637_v4  ;;  %v104_v19 = vld [vmem:[%s820_s0] sm:$0xff]  ;;  %v105_v23 = vld [vmem:[%s820_s0 + $0x8] sm:$0xff]  ;;  %vm170_vm2 = vcmask 1041409   ;;  %vm173_vm3 = vcmask 58368   ;;  %v638_v42 = vmov 0   ;;  %s639_s0 = smov 32  }
   0x9   :  { %553 = vmatmul.mubr.msk.bf16.vlgmr.msra.gmra.mxu0 %vm60_vm1, %v713_v3  ;;  %v720_v8 = vshrl.u32 %v110_v6, 7  ;;  %v528_v27 = vld [vmem:[%s826_s6] ss:$0 sm:$0xff]  ;;  %v161_v34 = vand.u32 127, %v110_v6  ;;  %588 = vset.pattern.permute.xlu0 %v638_v42  ;;  %vm266_vm4 = vcmask 1043456   ;;  %vm262_vm5 = vcmask 64512  }
   0xa   :  { %576 = vmatprep.mubr.msk.bf16.mxu0 %vm636_vm0, %v635_v1  ;;  %v109_v7 = vunpack.c.0.s8 %v108_v5  ;;  %587 = vset.pattern.permute.xlu1 %v638_v42  ;;  %v250_v5 = vld [vmem:[%s821_s1] sm:$0xf]  ;;  %vm428_vm6 = vcmask 523264   ;;  %s640_s15 = smov 64  }
   0xb   :  { %v730_v15 = vsub.s32 0, %v720_v8  ;;  %v748_v36 = vsub.s32 %v161_v34, %v720_v8  ;;  %v184_v43 = vsub.s32 1, %v720_v8  ;;  %v268_v6 = vsel %vm266_vm4, %v250_v5, 0 }
   0xc   :  { %v726_v10 = vsub.s32 %v109_v7, %v720_v8  ;;  %557 = vmatpush3.bf16.msra.mxu1 %v268_v6 }
   0xd   :  { %562 = vmatprep.subr.bf16.mxu1 %v635_v1 }
   0xe   :  { %v382_v59 = vrot.slane %v713_v3, %v726_v10 }
  0x10   :  { %v389_v60 = vrot.slane %v382_v59, %v726_v10 }
  0xc9   :  { %v98_v11 = vpop.f32.mrf.mxu0 }
  0xca   :  { %v99_v12 = vadd.f32 %v524_v9, %v98_v11  ;;  %v251_v11 = vld [vmem:[%s821_s1 + $0x4] sm:$0xf] }
  0xcb   :  { %v554_v13 = vpop.f32.mrf.mxu0 }
  0xcc   :  { %v113_v14 = vrot.slane %v99_v12, %v726_v10 }
  0xcd   :  { %v101_v16 = vpop.f32.mrf.mxu0 }
  0xce   :  { %v114_v17 = vcombine.high %v113_v14, %v113_v14  ;;  %v121_v18 = vrot.slane %v113_v14, %v726_v10  ;;  %v324_v14 = vsel %vm266_vm4, %v251_v11, 0 }
  0xcf   :  { %v555_v20 = vpop.f32.mrf.mxu0 }
  0xd0   :  { %v128_v21 = vrot.slane %v114_v17, %v726_v10  ;;  %v132_v22 = vrot.slane %v121_v18, %v730_v15  ;;  %v591_v18 = vld [vmem:[%s827_s7 + $0x18] sm:$0xff]   ;;  %v593_v20 = vld [vmem:[%s827_s7 + $0x8] sm:$0xff]  }
  0xd1   :  { %569 = vmatpush3.bf16.msra.mxu0 %v591_v18 }
  0xd2   :  { %v136_v24 = vrot.slane %v128_v21, %v730_v15  ;;  %v139_v25 = vadd.f32 %v132_v22, %v104_v19  ;;  %570 = vmatprep.subr.bf16.mxu0 %v635_v1  ;;  %v592_v19 = vld [vmem:[%s827_s7 + $0x10] sm:$0xff]   ;;  %v594_v21 = vld [vmem:[%s827_s7] sm:$0xff]  }
  0xd4   :  { %v140_v26 = vadd.f32 %v136_v24, %v105_v23  ;;  %595 = vtanh.f32 %v139_v25 }
  0xd5   :  { %571 = vmatpush3.bf16.msra.mxu0 %v592_v19 }
  0xd6   :  { %597 = vtanh.f32 %v140_v26  ;;  %572 = vmatprep.subr.bf16.mxu0 %v635_v1 }
  0xd9   :  { %573 = vmatpush3.bf16.msra.mxu0 %v593_v20 }
  0xda   :  { %574 = vmatprep.subr.bf16.mxu0 %v635_v1 }
  0xdd   :  { %575 = vmatpush3.bf16.msra.mxu0 %v594_v21 }
  0xe1   :  { %v596_v28 = vpop.eup %595 }
  0xe2   :  { %v150_v29 = vmul.f32 %v596_v28, %v528_v27 }
  0xe3   :  { %v598_v30 = vpop.eup %597 }
  0xe4   :  { %v152_v31 = vsel %vm60_vm1, %v150_v29, 0.0  ;;  %v151_v32 = vmul.f32 %v598_v30, %v528_v27 }
  0xe5   :  { %153 = vadd.xlane.f32.xlu0 %v152_v31 }
  0xe6   :  { %v155_v33 = vsel %vm60_vm1, %v151_v32, 0.0 }
  0xe9   :  { %156 = vadd.xlane.f32.xlu0 %v155_v33 }
 0x16e   :  { %v154_v35 = vpop.xlane.xlu0 %153 }
 0x16f   :  { %v165_v38 = vrot.slane %v154_v35, %v748_v36 }
 0x172   :  { %v157_v37 = vpop.xlane.xlu0 %156 }
 0x173   :  { %v169_v39 = vrot.slane %v157_v37, %v748_v36 }
 0x175   :  { %v171_v40 = vsel %vm170_vm2, %v169_v39, %v165_v38  ;;  %v403_v39 = vld [vmem:[%s828_s8] sm:$0x3] }
 0x176   :  { %v174_v41 = vsel %vm173_vm3, %v171_v40, -inf }
 0x177   :  { %175 = vmax.xlane.f32.xlu1 %v174_v41 }
 0x200   :  { %v176_v44 = vpop.xlane.xlu1 %175 }
 0x201   :  { %v181_v45 = vrot.slane %v176_v44, %v730_v15  ;;  %v185_v46 = vrot.slane %v176_v44, %v184_v43 }
 0x203   :  { %v188_v47 = vsub.f32 %v154_v35, %v181_v45  ;;  %v189_v48 = vsub.f32 %v157_v37, %v185_v46  ;;  %v477_v46 = vld [vmem:[%s823_s3] sm:$0x3]  ;;  %s641_s3 = smov [#allocation2]  }
 0x204   :  { %s514_s8 = sshll.u32 %s641_s3, 4  ;;  %s515_s8 = int_to_ptr.vmem [resolvable:$true] %s514_s8 }
 0x205   :  { %v190_v49 = vmul.f32 1.442695, %v188_v47  ;;  %v192_v50 = vmul.f32 1.442695, %v189_v48  ;;  %s613_s18 = scalar_lea.vmem %s515_s8, 32  ;;  %p618_p1 = scmp.lt.s32.totalorder %s515_s8, %s515_s8 }
 0x206   :  { %p614_p0 = scmp.ne.s32.totalorder %s515_s8, %s613_s18  ;;  %p619_p2 = scmp.lt.s32.totalorder %s613_s18, %s613_s18 }
 0x207   :  { %599 = vpow2.f32 %v190_v49 }
 0x208   :  { %601 = vpow2.f32 %v192_v50  ;;  %p620_p3 = por %p619_p2, %p618_p1 }
 0x20a   :  { %p621_p4 = pnand %p620_p3, %p614_p0 }
 0x214   :  { %v600_v51 = vpop.eup %599 }
 0x215   :  { %v602_v52 = vpop.eup %601  ;;  %197 = vperm.xlu1 %587, %v600_v51  }
 0x216   :  { %200 = vperm.xlu0 %588, %v602_v52  }
 0x290   :  { %v198_v53 = vpop.permute.xlu1 %197 }
 0x291   :  { %v201_v54 = vpop.permute.xlu0 %200  ;;  %v205_v55 = vrot.slane %v198_v53, %v748_v36 }
 0x292   :  { %v209_v56 = vrot.slane %v201_v54, %v748_v36 }
 0x294   :  { %v210_v57 = vsel %vm170_vm2, %v209_v56, %v205_v55 }
 0x295   :  { %v212_v58 = vsel %vm173_vm3, %v210_v57, 0.0 }
 0x296   :  { %213 = vadd.xlane.f32.xlu1 %v212_v58 }
 0x2a7   :  { %390 = vrot.lane.b32.xlu1 %v389_v60, %s639_s0 }
 0x31f   :  { %v214_v61 = vpop.xlane.xlu1 %213 }
 0x320   :  { %603 = vrcp.f32 %v214_v61 }
 0x323   :  { %v391_v37 = vpop.permute.xlu1 %390 }
 0x32d   :  { %v604_v62 = vpop.eup %603 }
 0x32e   :  { %v220_v63 = vrot.slane %v604_v62, %v730_v15  ;;  %v224_v0 = vrot.slane %v604_v62, %v184_v43 }
 0x330   :  { %v227_v2 = vmul.f32 %v600_v51, %v220_v63  ;;  %v765_v4 = vmul.f32 %v602_v52, %v224_v0 }
 0x332   :  { %232 = vperm.xlu1 %587, %v227_v2   ;;  %v248_v3 = vpack.c.bf16 %v227_v2, %v227_v2  ;;  %v249_v8 = vpack.c.bf16 %v765_v4, %v765_v4 }
 0x334   :  { %v253_v7 = vunpack.c.l.b16 %v248_v3  ;;  %v311_v9 = vunpack.c.l.b16 %v249_v8 }
 0x336   :  { %255 = vperm.xlu0 %588, %v253_v7  }
 0x33a   :  { %313 = vperm.xlu0 %588, %v311_v9  }
 0x3ad   :  { %v233_v61 = vpop.permute.xlu1 %232 }
 0x3ae   :  { %v240_v63 = vrot.slane %v233_v61, %v748_v36 }
 0x3b1   :  { %v256_v10 = vpop.permute.xlu0 %255 }
 0x3b2   :  { %v260_v12 = vrot.slane %v256_v10, %v748_v36 }
 0x3b4   :  { %v261_v13 = vpack.c.b16 %v260_v12, %v260_v12 }
 0x3b5   :  { %v314_v15 = vpop.permute.xlu0 %313 }
 0x3b6   :  { %559 = vmatmul.mubr.msk.bf16.vlgmr.msra.gmra.mxu1 %vm262_vm5, %v261_v13  ;;  %v318_v16 = vrot.slane %v314_v15, %v748_v36 }
 0x3b7   :  { %563 = vmatpush3.bf16.msra.mxu1 %v324_v14  ;;  %564 = vmatprep.mubr.msk.bf16.mxu1 %vm636_vm0, %v635_v1 }
 0x3b8   :  { %v319_v17 = vpack.c.b16 %v318_v16, %v318_v16 }
 0x3be   :  { %565 = vmatmul.mubr.msk.bf16.vlgmr.msra.gmra.mxu1 %vm262_vm5, %v319_v17 }
 0x476   :  { %v304_v22 = vpop.f32.mrf.mxu1 }
 0x477   :  { %v366_v27 = vpack.c.bf16 %v304_v22, %v304_v22 }
 0x478   :  { %v560_v23 = vpop.f32.mrf.mxu1 }
 0x479   :  { %v370_v32 = vunpack.c.l.b16 %v366_v27 }
 0x47a   :  { %v307_v24 = vpop.f32.mrf.mxu1 }
 0x47c   :  { %v561_v25 = vpop.f32.mrf.mxu1 }
 0x47e   :  { %v360_v26 = vpop.f32.mrf.mxu1 }
 0x47f   :  { %v367_v28 = vpack.c.bf16 %v360_v26, %v360_v26 }
 0x480   :  { %v566_v29 = vpop.f32.mrf.mxu1 }
 0x481   :  { %v371_v30 = vunpack.c.l.b16 %v367_v28 }
 0x482   :  { %v363_v31 = vpop.f32.mrf.mxu1 }
 0x483   :  { %v372_v33 = vrot.slane %v371_v30, 7 }
 0x484   :  { %v567_v34 = vpop.f32.mrf.mxu1 }
 0x485   :  { %v373_v1 = vsel %vm170_vm2, %v372_v33, %v370_v32 }
 0x486   :  { %v374_v35 = vpack.c.b16 %v373_v1, %v373_v1 }
 0x488   :  { %v394_v38 = vsel %vm60_vm1, %v374_v35, %v391_v37 }
 0x489   :  { %577 = vmatmul.mubr.msk.bf16.vlgmr.msra.gmra.mxu0 %vm428_vm6, %v394_v38 }
 0x549   :  { %v465_v40 = vpop.f32.mrf.mxu0 }
 0x54a   :  { %v466_v41 = vadd.f32 %v465_v40, %v403_v39 }
 0x54b   :  { %v578_v42 = vpop.f32.mrf.mxu0 }
 0x54c   :  { %605 = vtanh.f32 %v466_v41  ;;  %v471_v47 = vsub.f32 0.0, %v466_v41 }
 0x54d   :  { %v468_v43 = vpop.f32.mrf.mxu0 }
 0x54e   :  { %v472_v48 = vmul.f32 1.442695, %v471_v47 }
 0x54f   :  { %v579_v44 = vpop.f32.mrf.mxu0 }
 0x550   :  { %607 = vpow2.f32 %v472_v48 }
 0x559   :  { %v606_v45 = vpop.eup %605 }
 0x55a   :  { %484 = vrot.lane.b32.xlu0 %v606_v45, %s640_s15 }
 0x55d   :  { %v608_v49 = vpop.eup %607 }
 0x55e   :  { %479 = vrot.lane.b32.xlu0 %v477_v46, %s639_s0  ;;  %v474_v50 = vadd.f32 1.0, %v608_v49 }
 0x560   :  { %609 = vrcp.f32 %v474_v50 }
 0x56d   :  { %v610_v51 = vpop.eup %609 }
 0x5cc   :  { %v485_v52 = vpop.permute.xlu0 %484 }
 0x5cd   :  { %v487_v53 = vmul.f32 %v610_v51, %v485_v52 }
 0x5cf   :  { %489 = vrot.lane.b32.xlu0 %v487_v53, %s639_s0 }
 0x5d0   :  { %v480_v54 = vpop.permute.xlu0 %479 }
 0x5d1   :  { %v482_v55 = vmul.f32 %v610_v51, %v480_v54 }
 0x641   :  { %v490_v56 = vpop.permute.xlu0 %489 }
 0x642   :  { %v492_v57 = vadd.f32 %v490_v56, %v482_v55 }
 0x644   :  { %611 = vtanh.f32 %v492_v57 }
 0x651   :  { %v612_v58 = vpop.eup %611 }
 0x652   :  { %495 = vrot.lane.b32.xlu0 %v612_v58, %s640_s15 }
 0x656   :  { %235 = vperm.xlu0 %588, %v765_v4  }
 0x6c4   :  { %v496_v59 = vpop.permute.xlu0 %495 }
 0x6c5   :  { %v498_v60 = vmul.f32 %v610_v51, %v496_v59 }
 0x6c7   :  { %500 = vrot.lane.b32.xlu1 %v498_v60, %s639_s0 }
 0x6d1   :  { %v236_v62 = vpop.permute.xlu0 %235 }
 0x6d2   :  { %v244_v0 = vrot.slane %v236_v62, %v748_v36 }
 0x6d4   :  { %v245_v2 = vsel %vm170_vm2, %v244_v0, %v240_v63 }
 0x6d5   :  { %247 = vst.msk [vmem:[#allocation2] sm:$0x3] %vm173_vm3, %v245_v2 }
 0x6d6   :  { %624 = shalt.err (!%p621_p4)
}
 0x6d7   :  { %517 = dma.vmem_to_hbm [thread:$0]  %s515_s8, 32, %s830_s10, [#allocation3]   ;;  %vm504_vm7 = vcmask 517120  }
 0x739   :  { %v501_v4 = vpop.permute.xlu1 %500 }
 0x73a   :  { %v503_v36 = vsel %vm60_vm1, %v501_v4, %v492_v57 }
 0x73b   :  { %505 = vst.msk [vmem:[%s829_s9] sm:$0x3] %vm504_vm7, %v503_v36 }
 0x73c   :  { %633 = dma.done.wait [#allocation3], 32  }
 0x73d   :  { %634 = vsyncadd [#allocation3], 4294967264 }
 0x73e   :  { %523 = vsyncpa [#allocation3], 1 }

</bundles_post_ra>
